<compile_context>
chip_gen: v6e
topology: v6e:2x2x1
jax: 0.10.0
libtpu: 0.0.40
codegen_flags: <defaults>
</compile_context>

<pallas_src>
import functools

import jax
import jax.numpy as jnp
from jax.experimental import pallas as pl
from jax.experimental.pallas import tpu as pltpu


def _round_up(a, b):
    return (a + b - 1) // b * b


# ----------------------------------------------------------------------------
# Kernel: x tile (rows, P) bf16 -> 5 fused Linear layers (ReLU x4, sigmoid) -> out tile (rows, P)
# Weights pre-packed as a (5, P, P) bf16 stack, biases as a (5, 1, P) bf16 stack.
# ----------------------------------------------------------------------------
def ae_fwd_kernel(x_ref, w_ref, b_ref, o_ref):
    h = x_ref[...]                                   # already bf16 (streamed bf16 from HBM)
    # Layers 0..3: hidden layers (ReLU). bias-add + ReLU done in bf16 (one cast of the f32 acc).
    for layer in range(4):
        y = jnp.dot(h, w_ref[layer], preferred_element_type=jnp.float32)
        h = jnp.maximum(y.astype(jnp.bfloat16) + b_ref[layer], 0)
    # Layer 4: reconstruction head, sigmoid in f32.
    y = jnp.dot(h, w_ref[4], preferred_element_type=jnp.float32) + b_ref[4].astype(jnp.float32)
    o_ref[...] = jax.nn.sigmoid(y).astype(o_ref.dtype)


# ----------------------------------------------------------------------------
# One-time parameter packing (call OUTSIDE the per-step path):
#  * fuse encoder fc3 with decoder fc1 (no nonlinearity in between),
#  * block-diagonal (pack copies) + zero-pad each layer to (P, P),
#  * stack the 5 layers into single bf16 weight / bias slabs.
# ----------------------------------------------------------------------------
def pack_ae_params(params, input_dim, w_dtype=jnp.bfloat16):
    ps = [(jnp.asarray(w, jnp.float32), jnp.asarray(b, jnp.float32)) for (w, b) in params]
    (w1, b1), (w2, b2), (w3, b3), (w4, b4), (w5, b5), (w6, b6) = ps
    w34 = w3 @ w4                                  # latent proj  o  decoder fc1 (exact fusion)
    b34 = b3 @ w4 + b4
    fused = [(w1, b1), (w2, b2), (w34, b34), (w5, b5), (w6, b6)]

    pack = 128 // input_dim if (input_dim <= 128 and 128 % input_dim == 0) else 1
    max_dim = max(max(w.shape) for (w, _) in fused)
    P = _round_up(pack * max_dim, 128)             # uniform padded layer width (=128 here)

    ws, bs = [], []
    for (w, b) in fused:                           # w: (fan_in, fan_out), b: (1, fan_out)
        fin, fout = w.shape
        wp = jnp.zeros((P, P), jnp.float32)
        bp = jnp.zeros((1, P), jnp.float32)
        for k in range(pack):
            wp = wp.at[k * fin:(k + 1) * fin, k * fout:(k + 1) * fout].set(w)
            bp = bp.at[:, k * fout:(k + 1) * fout].set(b)
        ws.append(wp.astype(w_dtype))
        bs.append(bp.astype(w_dtype))
    return jnp.stack(ws), jnp.stack(bs), pack, P   # (5,P,P) bf16, (5,1,P) bf16


def _tiling(M, pack, tile_m):
    """Packed-row tiling: multiples of 16 sublanes (bf16 packing), >=4 steps for big batches."""
    g = 16                                          # bf16 native sublane packing
    Mg = pl.cdiv(M, pack)                           # packed rows needed
    Mg_pad = _round_up(max(Mg, 1), g)
    tile_rows_max = max(_round_up(max(tile_m // pack, 1), g), g)
    n_steps = pl.cdiv(Mg_pad, tile_rows_max)
    # v7x: 2 TensorCores share the "parallel" grid axis -- keep >=4 steps when data is big
    # enough that the extra tail padding stays small (<~12%).
    MIN_STEPS = 4
    if n_steps < MIN_STEPS and Mg_pad >= MIN_STEPS * 128:
        n_steps = MIN_STEPS
    tile_rows = _round_up(pl.cdiv(Mg_pad, n_steps), g)
    Mg_total = n_steps * tile_rows
    return tile_rows, n_steps, Mg_total


@functools.partial(jax.jit, static_argnames=("input_dim", "pack", "P", "tile_m"))
def ae_forward(x, w_stack, b_stack, *, input_dim, pack, P, tile_m=8192):
    """AENetwork.forward: x.view(-1, input_dim) -> encode -> decode -> sigmoid."""
    x2d = x.reshape(-1, input_dim)
    M = x2d.shape[0]

    tile_rows, n_steps, Mg_total = _tiling(M, pack, tile_m)
    Mp = Mg_total * pack                            # padded original-row count

    # Lane-dense bf16 packed view: (Mg_total, pack*input_dim), zero-padded to width P.
    xb = x2d.astype(jnp.bfloat16)
    if Mp != M:
        xb = jnp.pad(xb, ((0, Mp - M), (0, 0)))     # zero rows sliced off below (harmless)
    xp = xb.reshape(Mg_total, pack * input_dim)
    if P != pack * input_dim:
        xp = jnp.pad(xp, ((0, 0), (0, P - pack * input_dim)))

    n_layers = w_stack.shape[0]
    flops = 2 * Mg_total * P * P * n_layers
    bytes_accessed = xp.size * 2 + Mg_total * P * 4 + w_stack.size * 2 + b_stack.size * 2

    out = pl.pallas_call(
        ae_fwd_kernel,
        out_shape=jax.ShapeDtypeStruct((Mg_total, P), jnp.float32),
        grid_spec=pltpu.PrefetchScalarGridSpec(
            num_scalar_prefetch=0,
            grid=(n_steps,),
            in_specs=[
                pl.BlockSpec((tile_rows, P), lambda i: (i, 0)),          # activation stream
                pl.BlockSpec(w_stack.shape, lambda i: (0, 0, 0)),        # weight slab (resident)
                pl.BlockSpec(b_stack.shape, lambda i: (0, 0, 0)),        # bias slab (resident)
            ],
            out_specs=pl.BlockSpec((tile_rows, P), lambda i: (i, 0)),
        ),
        compiler_params=pltpu.CompilerParams(
            dimension_semantics=("parallel",),
            vmem_limit_bytes=48 << 20),
        cost_estimate=pl.CostEstimate(
            flops=flops,
            transcendentals=Mg_total * P,
            bytes_accessed=bytes_accessed),
    )(xp, w_stack, b_stack)

    # Unpack: drop feature padding (skipped when P == pack*input_dim), unfold packed rows,
    # drop batch padding (skipped when the batch tiled evenly).
    if P != pack * input_dim:
        out = out[:, :pack * input_dim]
    out = out.reshape(Mp, input_dim)
    if Mp != M:
        out = out[:M]
    return out


# ----------------------------------------------------------------------------
# Deterministic parameter init (PyTorch nn.Linear default: U(-1/sqrt(fan_in), +)).
# Stored as (in_features, out_features) so the kernel computes x @ W + b.
# ----------------------------------------------------------------------------
def init_linear(key, fan_in, fan_out, dtype=jnp.float32):
    kw, kb = jax.random.split(key)
    bound = 1.0 / jnp.sqrt(fan_in)
    w = jax.random.uniform(kw, (fan_in, fan_out), dtype, -bound, bound)
    b = jax.random.uniform(kb, (1, fan_out), dtype, -bound, bound)
    return w, b


def init_ae_params(key, input_dim, embedding_size, h1, h2):
    keys = jax.random.split(key, 6)
    return [
        init_linear(keys[0], input_dim, h1),        # encoder fc1
        init_linear(keys[1], h1, h2),               # encoder fc2
        init_linear(keys[2], h2, embedding_size),   # encoder fc3 -> latent
        init_linear(keys[3], embedding_size, h2),   # decoder fc1
        init_linear(keys[4], h2, h1),               # decoder fc2
        init_linear(keys[5], h1, input_dim),        # decoder fc3 -> reconstruction
    ]


def ae_forward_ref(x, params, input_dim):
    """Plain-JAX f32 reference (mirrors the PyTorch forward) for validation."""
    h = x.reshape(-1, input_dim)
    (w1, b1), (w2, b2), (w3, b3), (w4, b4), (w5, b5), (w6, b6) = params
    h = jnp.maximum(h @ w1 + b1, 0.0)
    h = jnp.maximum(h @ w2 + b2, 0.0)
    z = h @ w3 + b3
    h = jnp.maximum(z @ w4 + b4, 0.0)
    h = jnp.maximum(h @ w5 + b5, 0.0)
    return jax.nn.sigmoid(h @ w6 + b6)


if __name__ == "__main__":
    # Small shapes consistent with the module: args['embedding_size']=16, input_dim=64.
    input_dim = 64
    embedding_size = 16
    h1, h2 = 64, 32

    key = jax.random.PRNGKey(0)
    kx, kp = jax.random.split(key)

    # Arbitrary-shaped input; forward() flattens it via view(-1, input_dim).
    x = jax.random.normal(kx, (2, 4, input_dim), dtype=jnp.float32)   # -> (8, 64) rows
    params = init_ae_params(kp, input_dim, embedding_size, h1, h2)

    # Pack once at init (hoisted out of the per-call jitted path).
    w_stack, b_stack, pack, P = pack_ae_params(params, input_dim)

    out = ae_forward(x, w_stack, b_stack, input_dim=input_dim, pack=pack, P=P)
    out = jax.block_until_ready(out)

    ref = ae_forward_ref(x, params, input_dim)
    assert out.shape == (8, input_dim)
    # Kernel matmuls / activations are bf16 with f32 accumulation -> bf16-appropriate tolerance.
    assert jnp.allclose(out, ref, atol=2e-2, rtol=2e-2), "Pallas output mismatch vs JAX reference"

    print("KERNEL_OK")
</pallas_src>

<mosaic_0001>
module attributes {stable_mosaic.version = 11 : i64} {
  func.func @ae_fwd_kernel(%arg0: i32, %arg1: memref<16x128xbf16, #tpu.memory_space<vmem>>, %arg2: memref<5x128x128xbf16, #tpu.memory_space<vmem>>, %arg3: memref<5x1x128xbf16, #tpu.memory_space<vmem>>, %arg4: memref<16x128xf32, #tpu.memory_space<vmem>>) attributes {dimension_semantics = [#tpu.dimension_semantics<parallel>], iteration_bounds = array<i64: 1>, scalar_prefetch = 0 : i64, scratch_operands = 0 : i64, tpu.core_type = #tpu.core_type<tc>, window_params = [{transform_indices = @transform_0, window_bounds = array<i64: 16, 128>}, {pipeline_mode = #tpu.pipeline_mode<synchronous>, transform_indices = @transform_1, window_bounds = array<i64: 5, 128, 128>}, {pipeline_mode = #tpu.pipeline_mode<synchronous>, transform_indices = @transform_2, window_bounds = array<i64: 5, 1, 128>}, {transform_indices = @transform_3, window_bounds = array<i64: 16, 128>}]} {
    %c0 = arith.constant 0 : index
    %c0_0 = arith.constant 0 : index
    %0 = vector.load %arg1[%c0, %c0_0] : memref<16x128xbf16, #tpu.memory_space<vmem>>, vector<16x128xbf16>
    %c0_1 = arith.constant 0 : index
    %c0_2 = arith.constant 0 : index
    %c0_3 = arith.constant 0 : index
    %1 = vector.load %arg2[%c0_1, %c0_2, %c0_3] : memref<5x128x128xbf16, #tpu.memory_space<vmem>>, vector<1x128x128xbf16>
    %2 = vector.shape_cast %1 : vector<1x128x128xbf16> to vector<128x128xbf16>
    %cst = arith.constant dense<0.000000e+00> : vector<16x128xf32>
    %3 = tpu.matmul %0, %2, %cst {dimension_numbers = #tpu.dot_dimension_numbers<[1], [0], [0], [1], [0, 0, 1, 1], [], []>} : vector<16x128xbf16>, vector<128x128xbf16>, vector<16x128xf32> -> vector<16x128xf32>
    %4 = arith.truncf %3 : vector<16x128xf32> to vector<16x128xbf16>
    %c0_4 = arith.constant 0 : index
    %c0_5 = arith.constant 0 : index
    %c0_6 = arith.constant 0 : index
    %5 = vector.load %arg3[%c0_4, %c0_5, %c0_6] : memref<5x1x128xbf16, #tpu.memory_space<vmem>>, vector<1x1x128xbf16>
    %6 = vector.shape_cast %5 : vector<1x1x128xbf16> to vector<1x128xbf16>
    %7 = vector.broadcast %6 : vector<1x128xbf16> to vector<16x128xbf16>
    %8 = arith.addf %4, %7 : vector<16x128xbf16>
    %cst_7 = arith.constant 0.000000e+00 : bf16
    %9 = vector.broadcast %cst_7 : bf16 to vector<16x128xbf16>
    %10 = arith.maximumf %8, %9 : vector<16x128xbf16>
    %c1 = arith.constant 1 : index
    %c0_8 = arith.constant 0 : index
    %c0_9 = arith.constant 0 : index
    %11 = vector.load %arg2[%c1, %c0_8, %c0_9] : memref<5x128x128xbf16, #tpu.memory_space<vmem>>, vector<1x128x128xbf16>
    %12 = vector.shape_cast %11 : vector<1x128x128xbf16> to vector<128x128xbf16>
    %cst_10 = arith.constant dense<0.000000e+00> : vector<16x128xf32>
    %13 = tpu.matmul %10, %12, %cst_10 {dimension_numbers = #tpu.dot_dimension_numbers<[1], [0], [0], [1], [0, 0, 1, 1], [], []>} : vector<16x128xbf16>, vector<128x128xbf16>, vector<16x128xf32> -> vector<16x128xf32>
    %14 = arith.truncf %13 : vector<16x128xf32> to vector<16x128xbf16>
    %c1_11 = arith.constant 1 : index
    %c0_12 = arith.constant 0 : index
    %c0_13 = arith.constant 0 : index
    %15 = vector.load %arg3[%c1_11, %c0_12, %c0_13] : memref<5x1x128xbf16, #tpu.memory_space<vmem>>, vector<1x1x128xbf16>
    %16 = vector.shape_cast %15 : vector<1x1x128xbf16> to vector<1x128xbf16>
    %17 = vector.broadcast %16 : vector<1x128xbf16> to vector<16x128xbf16>
    %18 = arith.addf %14, %17 : vector<16x128xbf16>
    %cst_14 = arith.constant 0.000000e+00 : bf16
    %19 = vector.broadcast %cst_14 : bf16 to vector<16x128xbf16>
    %20 = arith.maximumf %18, %19 : vector<16x128xbf16>
    %c2 = arith.constant 2 : index
    %c0_15 = arith.constant 0 : index
    %c0_16 = arith.constant 0 : index
    %21 = vector.load %arg2[%c2, %c0_15, %c0_16] : memref<5x128x128xbf16, #tpu.memory_space<vmem>>, vector<1x128x128xbf16>
    %22 = vector.shape_cast %21 : vector<1x128x128xbf16> to vector<128x128xbf16>
    %cst_17 = arith.constant dense<0.000000e+00> : vector<16x128xf32>
    %23 = tpu.matmul %20, %22, %cst_17 {dimension_numbers = #tpu.dot_dimension_numbers<[1], [0], [0], [1], [0, 0, 1, 1], [], []>} : vector<16x128xbf16>, vector<128x128xbf16>, vector<16x128xf32> -> vector<16x128xf32>
    %24 = arith.truncf %23 : vector<16x128xf32> to vector<16x128xbf16>
    %c2_18 = arith.constant 2 : index
    %c0_19 = arith.constant 0 : index
    %c0_20 = arith.constant 0 : index
    %25 = vector.load %arg3[%c2_18, %c0_19, %c0_20] : memref<5x1x128xbf16, #tpu.memory_space<vmem>>, vector<1x1x128xbf16>
    %26 = vector.shape_cast %25 : vector<1x1x128xbf16> to vector<1x128xbf16>
    %27 = vector.broadcast %26 : vector<1x128xbf16> to vector<16x128xbf16>
    %28 = arith.addf %24, %27 : vector<16x128xbf16>
    %cst_21 = arith.constant 0.000000e+00 : bf16
    %29 = vector.broadcast %cst_21 : bf16 to vector<16x128xbf16>
    %30 = arith.maximumf %28, %29 : vector<16x128xbf16>
    %c3 = arith.constant 3 : index
    %c0_22 = arith.constant 0 : index
    %c0_23 = arith.constant 0 : index
    %31 = vector.load %arg2[%c3, %c0_22, %c0_23] : memref<5x128x128xbf16, #tpu.memory_space<vmem>>, vector<1x128x128xbf16>
    %32 = vector.shape_cast %31 : vector<1x128x128xbf16> to vector<128x128xbf16>
    %cst_24 = arith.constant dense<0.000000e+00> : vector<16x128xf32>
    %33 = tpu.matmul %30, %32, %cst_24 {dimension_numbers = #tpu.dot_dimension_numbers<[1], [0], [0], [1], [0, 0, 1, 1], [], []>} : vector<16x128xbf16>, vector<128x128xbf16>, vector<16x128xf32> -> vector<16x128xf32>
    %34 = arith.truncf %33 : vector<16x128xf32> to vector<16x128xbf16>
    %c3_25 = arith.constant 3 : index
    %c0_26 = arith.constant 0 : index
    %c0_27 = arith.constant 0 : index
    %35 = vector.load %arg3[%c3_25, %c0_26, %c0_27] : memref<5x1x128xbf16, #tpu.memory_space<vmem>>, vector<1x1x128xbf16>
    %36 = vector.shape_cast %35 : vector<1x1x128xbf16> to vector<1x128xbf16>
    %37 = vector.broadcast %36 : vector<1x128xbf16> to vector<16x128xbf16>
    %38 = arith.addf %34, %37 : vector<16x128xbf16>
    %cst_28 = arith.constant 0.000000e+00 : bf16
    %39 = vector.broadcast %cst_28 : bf16 to vector<16x128xbf16>
    %40 = arith.maximumf %38, %39 : vector<16x128xbf16>
    %c4 = arith.constant 4 : index
    %c0_29 = arith.constant 0 : index
    %c0_30 = arith.constant 0 : index
    %41 = vector.load %arg2[%c4, %c0_29, %c0_30] : memref<5x128x128xbf16, #tpu.memory_space<vmem>>, vector<1x128x128xbf16>
    %42 = vector.shape_cast %41 : vector<1x128x128xbf16> to vector<128x128xbf16>
    %cst_31 = arith.constant dense<0.000000e+00> : vector<16x128xf32>
    %43 = tpu.matmul %40, %42, %cst_31 {dimension_numbers = #tpu.dot_dimension_numbers<[1], [0], [0], [1], [0, 0, 1, 1], [], []>} : vector<16x128xbf16>, vector<128x128xbf16>, vector<16x128xf32> -> vector<16x128xf32>
    %c4_32 = arith.constant 4 : index
    %c0_33 = arith.constant 0 : index
    %c0_34 = arith.constant 0 : index
    %44 = vector.load %arg3[%c4_32, %c0_33, %c0_34] : memref<5x1x128xbf16, #tpu.memory_space<vmem>>, vector<1x1x128xbf16>
    %45 = vector.shape_cast %44 : vector<1x1x128xbf16> to vector<1x128xbf16>
    %46 = arith.extf %45 : vector<1x128xbf16> to vector<1x128xf32>
    %47 = vector.broadcast %46 : vector<1x128xf32> to vector<16x128xf32>
    %48 = arith.addf %43, %47 : vector<16x128xf32>
    %49 = arith.negf %48 : vector<16x128xf32>
    %50 = math.exp %49 : vector<16x128xf32>
    %cst_35 = arith.constant 1.000000e+00 : f32
    %51 = vector.broadcast %cst_35 : f32 to vector<16x128xf32>
    %52 = arith.addf %51, %50 : vector<16x128xf32>
    %53 = arith.divf %51, %52 : vector<16x128xf32>
    %c0_36 = arith.constant 0 : index
    %c0_37 = arith.constant 0 : index
    %54 = vector.load %arg4[%c0_36, %c0_37] : memref<16x128xf32, #tpu.memory_space<vmem>>, vector<16x128xf32>
    tpu.vector_store %arg4[%c0_36, %c0_37], %53 {strides = array<i32>} : memref<16x128xf32, #tpu.memory_space<vmem>>, vector<16x128xf32>,
    return
  }
  func.func @transform_0(%arg0: i32) -> (i32, i32) {
    %c0_i32 = arith.constant 0 : i32
    %c0_i32_0 = arith.constant 0 : i32
    return %arg0, %c0_i32 : i32, i32
  }
  func.func @transform_1(%arg0: i32) -> (i32, i32, i32) {
    %c0_i32 = arith.constant 0 : i32
    %c0_i32_0 = arith.constant 0 : i32
    %c0_i32_1 = arith.constant 0 : i32
    %c0_i32_2 = arith.constant 0 : i32
    return %c0_i32, %c0_i32_0, %c0_i32_1 : i32, i32, i32
  }
  func.func @transform_2(%arg0: i32) -> (i32, i32, i32) {
    %c0_i32 = arith.constant 0 : i32
    %c0_i32_0 = arith.constant 0 : i32
    %c0_i32_1 = arith.constant 0 : i32
    %c0_i32_2 = arith.constant 0 : i32
    return %c0_i32, %c0_i32_0, %c0_i32_1 : i32, i32, i32
  }
  func.func @transform_3(%arg0: i32) -> (i32, i32) {
    %c0_i32 = arith.constant 0 : i32
    %c0_i32_0 = arith.constant 0 : i32
    return %arg0, %c0_i32 : i32, i32
  }
}

</mosaic_0001>

<bundles_post_ra>
// kernel: ae_forward.1
= control target key start
LH: loop header
LB: loop body
LE: loop exit
PB: predicated region body
PF: predicated region fallthrough
CT: control target
= control target key end

     0   :  { %8 = vsyncpa [#allocation3], 0  ;;  %s908_s12 = smov [#allocation2]   ;;  %s1022_s0 = inlined_call_operand.vmem [shape: bf16[16,128], index: 0, kind: input, shape index: {}]   ;;  %s1023_s1 = inlined_call_operand.hbm [shape: bf16[5,128,128], index: 1, kind: input, shape index: {}]   ;;  %s1024_s2 = inlined_call_operand.vmem [shape: bf16[5,1,128], index: 2, kind: input, shape index: {}]   ;;  %s1025_s3 = inlined_call_operand.vmem [shape: f32[16,128], index: 3, kind: output, shape index: {}]  }
   0x1   :  { %s16_s13 = sshll.u32 %s908_s12, 4  ;;  %s17_s13 = int_to_ptr.vmem [resolvable:$true] %s16_s13 }
   0x2   :  { %s894_s14 = scalar_lea.vmem %s17_s13, 5120  ;;  %p899_p1 = scmp.lt.s32.totalorder %s17_s13, %s17_s13 }
   0x3   :  { %p895_p0 = scmp.ne.s32.totalorder %s17_s13, %s894_s14  ;;  %p900_p2 = scmp.lt.s32.totalorder %s894_s14, %s894_s14 }
   0x5   :  { %p901_p3 = por %p900_p2, %p899_p1 }
   0x7   :  { %p902_p4 = pnand %p901_p3, %p895_p0 }
   0x9   :  { %905 = shalt.err (!%p902_p4)
}
   0xa   :  { %s909_s15 = smov 64   ;;  %s910_s16 = smov 4  }
   0xb   :  { %22 = dma.hbm_to_vmem [thread:$0]  %s1023_s1, 5120, %s17_s13, [#allocation3], %s909_s15, %s909_s15, %s910_s16  }
   0xc   :  { %906 = dma.done.wait [#allocation3], 5120  }
   0xd   :  { %907 = vsyncadd [#allocation3], 4294962176  ;;  %v911_v0 = vmov 0.0   ;;  %vm912_vm0 = vmmov 0   ;;  %v837_v1 = vld [vmem:[#allocation2 + $0x38] sm:$0xff]   ;;  %v838_v2 = vld [vmem:[#allocation2 + $0x30] sm:$0xff]   ;;  %v147_v23 = vlaneseq }
   0xe   :  { %731 = vmatprep.subr.bf16.mxu0 %v911_v0  ;;  %747 = vmatprep.mubr.msk.bf16.mxu0 %vm912_vm0, %v911_v0  ;;  %v839_v3 = vld [vmem:[#allocation2 + $0x28] sm:$0xff]   ;;  %v846_v4 = vld [vmem:[#allocation2 + $0x78] sm:$0xff]   ;;  %v840_v5 = vld [vmem:[#allocation2 + $0x20] sm:$0xff]   ;;  %v913_v35 = vmov 0  }
   0xf   :  { %751 = vmatprep.subr.bf16.mxu1 %v911_v0  ;;  %767 = vmatprep.mubr.msk.bf16.mxu1 %vm912_vm0, %v911_v0  ;;  %v847_v6 = vld [vmem:[#allocation2 + $0x70] sm:$0xff]   ;;  %v841_v7 = vld [vmem:[#allocation2 + $0x18] sm:$0xff]   ;;  %v848_v8 = vld [vmem:[#allocation2 + $0x68] sm:$0xff]   ;;  %v148_v24 = vshrl.u32 %v147_v23, 7 }
  0x10   :  { %732 = vmatpush3.bf16.msra.mxu0 %v837_v1  ;;  %752 = vmatpush3.bf16.msra.mxu1 %v846_v4  ;;  %v842_v9 = vld [vmem:[#allocation2 + $0x10] sm:$0xff]   ;;  %v849_v10 = vld [vmem:[#allocation2 + $0x60] sm:$0xff]   ;;  %v843_v11 = vld [vmem:[#allocation2 + $0x8] sm:$0xff]  }
  0x11   :  { %733 = vmatprep.subr.bf16.mxu0 %v911_v0  ;;  %753 = vmatprep.subr.bf16.mxu1 %v911_v0  ;;  %v850_v12 = vld [vmem:[#allocation2 + $0x58] sm:$0xff]   ;;  %v844_v13 = vld [vmem:[#allocation2] sm:$0xff]   ;;  %v851_v15 = vld [vmem:[#allocation2 + $0x50] sm:$0xff]   ;;  %v972_v27 = vsub.s32 0, %v148_v24 }
  0x12   :  { %v845_v14 = vld [vmem:[%s1022_s0] sm:$0xff]   ;;  %v852_v16 = vld [vmem:[#allocation2 + $0x48] sm:$0xff]   ;;  %v854_v18 = vld [vmem:[#allocation2 + $0xb8] sm:$0xff]  }
  0x13   :  { %v853_v17 = vld [vmem:[#allocation2 + $0x40] sm:$0xff]   ;;  %v855_v19 = vld [vmem:[#allocation2 + $0xb0] sm:$0xff]   ;;  %v856_v20 = vld [vmem:[#allocation2 + $0xa8] sm:$0xff]  }
  0x14   :  { %734 = vmatpush3.bf16.msra.mxu0 %v838_v2  ;;  %754 = vmatpush3.bf16.msra.mxu1 %v847_v6  ;;  %v857_v21 = vld [vmem:[#allocation2 + $0xa0] sm:$0xff]   ;;  %v858_v22 = vld [vmem:[#allocation2 + $0x98] sm:$0xff]   ;;  %v859_v37 = vld [vmem:[#allocation2 + $0x90] sm:$0xff]  }
  0x15   :  { %735 = vmatprep.subr.bf16.mxu0 %v911_v0  ;;  %755 = vmatprep.subr.bf16.mxu1 %v911_v0  ;;  %v143_v25 = vld [vmem:[%s1024_s2] sm:$0x1]  ;;  %v860_v38 = vld [vmem:[#allocation2 + $0x88] sm:$0xff]   ;;  %v862_v40 = vld [vmem:[#allocation2 + $0xf8] sm:$0xff]  }
  0x16   :  { %v145_v26 = vpack.i.b16 %v143_v25, %v143_v25  ;;  %v861_v39 = vld [vmem:[#allocation2 + $0x80] sm:$0xff]   ;;  %v863_v41 = vld [vmem:[#allocation2 + $0xf0] sm:$0xff]   ;;  %v864_v42 = vld [vmem:[#allocation2 + $0xe8] sm:$0xff]  }
  0x17   :  { %v865_v43 = vld [vmem:[#allocation2 + $0xe0] sm:$0xff]   ;;  %v866_v44 = vld [vmem:[#allocation2 + $0xd8] sm:$0xff]   ;;  %v867_v55 = vld [vmem:[#allocation2 + $0xd0] sm:$0xff]  }
  0x18   :  { %736 = vmatpush3.bf16.msra.mxu0 %v839_v3  ;;  %756 = vmatpush3.bf16.msra.mxu1 %v848_v8  ;;  %v150_v30 = vrot.slane %v145_v26, %v972_v27  ;;  %v656_v45 = vld [vmem:[%s1024_s2 + $0x1] sm:$0x1]  ;;  %v868_v56 = vld [vmem:[#allocation2 + $0xc8] sm:$0xff]   ;;  %v870_v58 = vld [vmem:[#allocation2 + $0x138] sm:$0xff]  }
  0x19   :  { %737 = vmatprep.subr.bf16.mxu0 %v911_v0  ;;  %757 = vmatprep.subr.bf16.mxu1 %v911_v0  ;;  %v263_v46 = vpack.i.b16 %v656_v45, %v656_v45  ;;  %v869_v57 = vld [vmem:[#allocation2 + $0xc0] sm:$0xff]   ;;  %v871_v59 = vld [vmem:[#allocation2 + $0x130] sm:$0xff]   ;;  %v872_v60 = vld [vmem:[#allocation2 + $0x128] sm:$0xff]  }
  0x1a   :  { %v873_v61 = vld [vmem:[#allocation2 + $0x120] sm:$0xff]   ;;  %v874_v62 = vld [vmem:[#allocation2 + $0x118] sm:$0xff]  }
  0x1b   :  { %v268_v49 = vrot.slane %v263_v46, %v972_v27  ;;  %v665_v63 = vld [vmem:[%s1024_s2 + $0x2] sm:$0x1] }
  0x1c   :  { %738 = vmatpush3.bf16.msra.mxu0 %v840_v5  ;;  %758 = vmatpush3.bf16.msra.mxu1 %v849_v10  ;;  %v381_v1 = vpack.i.b16 %v665_v63, %v665_v63  ;;  %v875_v10 = vld [vmem:[#allocation2 + $0x110] sm:$0xff]  }
  0x1d   :  { %739 = vmatprep.subr.bf16.mxu0 %v911_v0  ;;  %759 = vmatprep.subr.bf16.mxu1 %v911_v0 }
  0x1e   :  { %v386_v4 = vrot.slane %v381_v1, %v972_v27 }
  0x20   :  { %740 = vmatpush3.bf16.msra.mxu0 %v841_v7  ;;  %760 = vmatpush3.bf16.msra.mxu1 %v850_v12  ;;  %v877_v12 = vld [vmem:[#allocation2 + $0x100] sm:$0xff]  }
  0x21   :  { %741 = vmatprep.subr.bf16.mxu0 %v911_v0  ;;  %761 = vmatprep.subr.bf16.mxu1 %v911_v0 }
  0x24   :  { %742 = vmatpush3.bf16.msra.mxu0 %v842_v9  ;;  %762 = vmatpush3.bf16.msra.mxu1 %v851_v15 }
  0x25   :  { %743 = vmatprep.subr.bf16.mxu0 %v911_v0  ;;  %763 = vmatprep.subr.bf16.mxu1 %v911_v0 }
  0x28   :  { %744 = vmatpush3.bf16.msra.mxu0 %v843_v11  ;;  %764 = vmatpush3.bf16.msra.mxu1 %v852_v16  ;;  %v876_v11 = vld [vmem:[#allocation2 + $0x108] sm:$0xff]  }
  0x29   :  { %745 = vmatprep.subr.bf16.mxu0 %v911_v0  ;;  %765 = vmatprep.subr.bf16.mxu1 %v911_v0 }
  0x2c   :  { %746 = vmatpush3.bf16.msra.mxu0 %v844_v13  ;;  %766 = vmatpush3.bf16.msra.mxu1 %v853_v17  ;;  %v674_v13 = vld [vmem:[%s1024_s2 + $0x3] sm:$0x1] }
  0x2d   :  { %771 = vmatprep.subr.bf16.mxu0 %v911_v0  ;;  %791 = vmatprep.subr.bf16.mxu1 %v911_v0 }
  0x2f   :  { %748 = vmatmul.mubr.bf16.vlgmr.msra.gmra.mxu0 %v845_v14  ;;  %v499_v14 = vpack.i.b16 %v674_v13, %v674_v13 }
  0x30   :  { %787 = vmatprep.mubr.msk.bf16.mxu0 %vm912_vm0, %v911_v0  ;;  %772 = vmatpush3.bf16.msra.mxu0 %v854_v18 }
  0x31   :  { %773 = vmatprep.subr.bf16.mxu0 %v911_v0  ;;  %v504_v17 = vrot.slane %v499_v14, %v972_v27 }
  0x34   :  { %774 = vmatpush3.bf16.msra.mxu0 %v855_v19 }
  0x35   :  { %775 = vmatprep.subr.bf16.mxu0 %v911_v0 }
  0x38   :  { %776 = vmatpush3.bf16.msra.mxu0 %v856_v20 }
  0x39   :  { %777 = vmatprep.subr.bf16.mxu0 %v911_v0 }
  0x3c   :  { %778 = vmatpush3.bf16.msra.mxu0 %v857_v21 }
  0x3d   :  { %779 = vmatprep.subr.bf16.mxu0 %v911_v0 }
  0x40   :  { %780 = vmatpush3.bf16.msra.mxu0 %v858_v22 }
  0x41   :  { %781 = vmatprep.subr.bf16.mxu0 %v911_v0 }
  0x44   :  { %782 = vmatpush3.bf16.msra.mxu0 %v859_v37 }
  0x45   :  { %783 = vmatprep.subr.bf16.mxu0 %v911_v0 }
  0x48   :  { %784 = vmatpush3.bf16.msra.mxu0 %v860_v38 }
  0x49   :  { %785 = vmatprep.subr.bf16.mxu0 %v911_v0 }
  0x4c   :  { %786 = vmatpush3.bf16.msra.mxu0 %v861_v39 }
  0x4d   :  { %811 = vmatprep.subr.bf16.mxu0 %v911_v0 }
  0xef   :  { %v135_v28 = vpop.f32.mrf.mxu0 }
  0xf1   :  { %v749_v29 = vpop.f32.mrf.mxu0 }
  0xf3   :  { %v138_v31 = vpop.f32.mrf.mxu0 }
  0xf4   :  { %v142_v32 = vpack.c.bf16 %v138_v31, %v135_v28 }
  0xf5   :  { %v750_v33 = vpop.f32.mrf.mxu0 }
  0xf6   :  { %v151_v34 = vadd.bf16 %v150_v30, %v142_v32 }
  0xf8   :  { %v152_v36 = vmax.bf16 %v913_v35, %v151_v34 }
  0xfa   :  { %768 = vmatmul.mubr.bf16.vlgmr.msra.gmra.mxu1 %v152_v36 }
  0xfb   :  { %807 = vmatprep.mubr.msk.bf16.mxu1 %vm912_vm0, %v911_v0  ;;  %792 = vmatpush3.bf16.msra.mxu1 %v862_v40 }
  0xfc   :  { %793 = vmatprep.subr.bf16.mxu1 %v911_v0 }
  0xff   :  { %794 = vmatpush3.bf16.msra.mxu1 %v863_v41 }
 0x100   :  { %795 = vmatprep.subr.bf16.mxu1 %v911_v0 }
 0x103   :  { %796 = vmatpush3.bf16.msra.mxu1 %v864_v42 }
 0x104   :  { %797 = vmatprep.subr.bf16.mxu1 %v911_v0 }
 0x107   :  { %798 = vmatpush3.bf16.msra.mxu1 %v865_v43 }
 0x108   :  { %799 = vmatprep.subr.bf16.mxu1 %v911_v0 }
 0x10b   :  { %800 = vmatpush3.bf16.msra.mxu1 %v866_v44 }
 0x10c   :  { %801 = vmatprep.subr.bf16.mxu1 %v911_v0 }
 0x10f   :  { %802 = vmatpush3.bf16.msra.mxu1 %v867_v55 }
 0x110   :  { %803 = vmatprep.subr.bf16.mxu1 %v911_v0 }
 0x113   :  { %804 = vmatpush3.bf16.msra.mxu1 %v868_v56 }
 0x114   :  { %805 = vmatprep.subr.bf16.mxu1 %v911_v0 }
 0x117   :  { %806 = vmatpush3.bf16.msra.mxu1 %v869_v57 }
 0x1ba   :  { %v252_v47 = vpop.f32.mrf.mxu1 }
 0x1bc   :  { %v769_v48 = vpop.f32.mrf.mxu1 }
 0x1be   :  { %v255_v50 = vpop.f32.mrf.mxu1 }
 0x1bf   :  { %v259_v51 = vpack.c.bf16 %v255_v50, %v252_v47 }
 0x1c0   :  { %v770_v52 = vpop.f32.mrf.mxu1 }
 0x1c1   :  { %v269_v53 = vadd.bf16 %v268_v49, %v259_v51 }
 0x1c3   :  { %v270_v54 = vmax.bf16 %v913_v35, %v269_v53 }
 0x1c5   :  { %788 = vmatmul.mubr.bf16.vlgmr.msra.gmra.mxu0 %v270_v54 }
 0x1c6   :  { %827 = vmatprep.mubr.msk.bf16.mxu0 %vm912_vm0, %v911_v0  ;;  %812 = vmatpush3.bf16.msra.mxu0 %v870_v58 }
 0x1c7   :  { %813 = vmatprep.subr.bf16.mxu0 %v911_v0 }
 0x1ca   :  { %814 = vmatpush3.bf16.msra.mxu0 %v871_v59 }
 0x1cb   :  { %815 = vmatprep.subr.bf16.mxu0 %v911_v0 }
 0x1ce   :  { %816 = vmatpush3.bf16.msra.mxu0 %v872_v60 }
 0x1cf   :  { %817 = vmatprep.subr.bf16.mxu0 %v911_v0 }
 0x1d2   :  { %818 = vmatpush3.bf16.msra.mxu0 %v873_v61 }
 0x1d3   :  { %819 = vmatprep.subr.bf16.mxu0 %v911_v0 }
 0x1d6   :  { %820 = vmatpush3.bf16.msra.mxu0 %v874_v62 }
 0x1d7   :  { %821 = vmatprep.subr.bf16.mxu0 %v911_v0 }
 0x1da   :  { %822 = vmatpush3.bf16.msra.mxu0 %v875_v10 }
 0x1db   :  { %823 = vmatprep.subr.bf16.mxu0 %v911_v0 }
 0x1de   :  { %824 = vmatpush3.bf16.msra.mxu0 %v876_v11 }
 0x1df   :  { %825 = vmatprep.subr.bf16.mxu0 %v911_v0  ;;  %v675_v0 = vld [vmem:[%s1024_s2 + $0x4] sm:$0x1] }
 0x1e0   :  { %v526_v23 = vunpack.c.l.bf16 %v675_v0 }
 0x1e2   :  { %826 = vmatpush3.bf16.msra.mxu0 %v877_v12  ;;  %v530_v24 = vrot.slane %v526_v23, %v972_v27 }
 0x285   :  { %v370_v2 = vpop.f32.mrf.mxu0 }
 0x287   :  { %v789_v3 = vpop.f32.mrf.mxu0 }
 0x289   :  { %v373_v5 = vpop.f32.mrf.mxu0 }
 0x28a   :  { %v377_v6 = vpack.c.bf16 %v373_v5, %v370_v2 }
 0x28b   :  { %v790_v7 = vpop.f32.mrf.mxu0 }
 0x28c   :  { %v387_v8 = vadd.bf16 %v386_v4, %v377_v6 }
 0x28e   :  { %v388_v9 = vmax.bf16 %v913_v35, %v387_v8 }
 0x290   :  { %808 = vmatmul.mubr.bf16.vlgmr.msra.gmra.mxu1 %v388_v9 }
 0x350   :  { %v488_v15 = vpop.f32.mrf.mxu1 }
 0x352   :  { %v809_v16 = vpop.f32.mrf.mxu1 }
 0x354   :  { %v491_v18 = vpop.f32.mrf.mxu1 }
 0x355   :  { %v495_v19 = vpack.c.bf16 %v491_v18, %v488_v15 }
 0x356   :  { %v810_v20 = vpop.f32.mrf.mxu1 }
 0x357   :  { %v505_v21 = vadd.bf16 %v504_v17, %v495_v19 }
 0x359   :  { %v506_v22 = vmax.bf16 %v913_v35, %v505_v21 }
 0x35b   :  { %828 = vmatmul.mubr.bf16.vlgmr.msra.gmra.mxu0 %v506_v22 }
 0x41b   :  { %v613_v25 = vpop.f32.mrf.mxu0 }
 0x41c   :  { %v614_v26 = vadd.f32 %v613_v25, %v530_v24 }
 0x41d   :  { %v829_v28 = vpop.f32.mrf.mxu0 }
 0x41e   :  { %v684_v29 = vmul.f32 -1.442695, %v614_v26 }
 0x41f   :  { %v616_v30 = vpop.f32.mrf.mxu0 }
 0x420   :  { %878 = vpow2.f32 %v684_v29  ;;  %v617_v31 = vadd.f32 %v616_v30, %v530_v24 }
 0x421   :  { %v830_v32 = vpop.f32.mrf.mxu0 }
 0x422   :  { %v685_v33 = vmul.f32 -1.442695, %v617_v31 }
 0x424   :  { %880 = vpow2.f32 %v685_v33 }
 0x42d   :  { %v879_v34 = vpop.eup %878 }
 0x42e   :  { %v626_v35 = vadd.f32 1.0, %v879_v34 }
 0x430   :  { %882 = vrcp.f32 %v626_v35 }
 0x431   :  { %v881_v36 = vpop.eup %880 }
 0x432   :  { %v627_v37 = vadd.f32 1.0, %v881_v36 }
 0x434   :  { %884 = vrcp.f32 %v627_v37 }
 0x43d   :  { %v883_v38 = vpop.eup %882 }
 0x43e   :  { %632 = vst [vmem:[%s1025_s3] sm:$0xff] %v883_v38 }
 0x441   :  { %v885_v27 = vpop.eup %884 }
 0x442   :  { %633 = vst [vmem:[%s1025_s3 + $0x8] sm:$0xff] %v885_v27 }
 0x443   :  { %638 = vsyncpa [#allocation3], 1 }

</bundles_post_ra>
